<compile_context>
chip_gen: v7x
topology: tpu7x:2x2x1
jax: 0.10.0
libtpu: 0.0.40
codegen_flags: <defaults>
</compile_context>

<pallas_src>
import functools

import jax
import jax.numpy as jnp
from jax.experimental import pallas as pl
from jax.experimental.pallas import tpu as pltpu

LANE = 128          # TPU lane width
NEG_BIAS = -30.0    # sigmoid(-30) ~ 1e-13 -> padded box columns are ~0


# ----------------------------------------------------------------------------
# small helpers
# ----------------------------------------------------------------------------
def _ceil_to(x, m):
    return ((x + m - 1) // m) * m


def _row_plan(M, max_tm=256):
    """Row tile (multiple of 16, bf16-native sublane tile) and padded row count."""
    tm = _ceil_to(min(M, max_tm), 16)
    Mp = _ceil_to(M, tm)
    return Mp, tm


def _place2(a, rows, cols, r0=0, c0=0, dtype=jnp.float32):
    """Zero-pad 2-D `a` into a (rows, cols) array with `a` at offset (r0, c0)."""
    a = jnp.asarray(a, dtype)
    r, c = a.shape
    return jnp.pad(a, ((r0, rows - r0 - r), (c0, cols - c0 - c)))


def _pad_w(w, rows=LANE, cols=LANE, c0=0):
    return _place2(w, rows, cols, 0, c0, jnp.bfloat16)


def _pad_b(b, cols=LANE, c0=0):
    return _place2(jnp.asarray(b).reshape(1, -1), 1, cols, 0, c0, jnp.float32)


# ----------------------------------------------------------------------------
# Pallas kernels
# ----------------------------------------------------------------------------
def _pixel_mem_kernel(feat_ref, bbw_ref, bbb_ref, posw_ref, posb_ref,
                      inpw_ref, inpb_ref, o_ref, acc_ref, *, pixels, tm):
    """Fused per-pixel projections + masked-sum reduction.

    src    = feat @ bbW + bbb           (K=3 -> three VPU broadcast-FMAs)
    encpos = (src @ posW + posb) + (src @ inpW + inpb)
    acc   += sum over valid rows of encpos   (per-batch accumulator output)
    """
    f32 = jnp.float32
    j = pl.program_id(1)

    @pl.when(j == 0)
    def _():
        acc_ref[...] = jnp.zeros_like(acc_ref)

    x = feat_ref[...]                                   # (tm, 3) f32 raw pixels
    w = bbw_ref[...]                                    # (8, 128) f32, rows 0..2 real
    src = (x[:, 0:1] * w[0:1, :] + x[:, 1:2] * w[1:2, :]
           + x[:, 2:3] * w[2:3, :] + bbb_ref[...])      # (tm, 128) f32
    src_bf = src.astype(jnp.bfloat16)
    pos = jnp.dot(src_bf, posw_ref[...], preferred_element_type=f32) + posb_ref[...]
    enc = jnp.dot(src_bf, inpw_ref[...], preferred_element_type=f32) + inpb_ref[...]
    encpos = enc + pos                                  # (tm, 128) f32

    # valid-row mask (handles row padding).  TODO(synk): real NestedTensor masks.
    row = j * tm + jax.lax.broadcasted_iota(jnp.int32, (tm, 1), 0)
    valid = (row < pixels).astype(f32)
    partial = jnp.sum(encpos * valid, axis=0, keepdims=True)      # (1, 128)
    acc_ref[...] = acc_ref[...] + jnp.broadcast_to(partial, acc_ref.shape)
    o_ref[...] = acc_ref[...]


def _decoder_heads_kernel(x_ref, dw_ref, db_ref, clsw_ref, clsb_ref,
                          w1_ref, b1_ref, w2_ref, b2_ref, w3_ref, b3_ref,
                          o_ref, *, num_layers):
    """All surrogate decoder layers + all four DETRHOI heads fused.

    Per layer: y = relu(h @ decW + decb); heads run on y in-vregs:
      cls  = y @ clsW + clsb                 (verb logits cols [0,Cv), obj [Cv,Cv+Co))
      box  = sigmoid(MLP3_packed(y))         (obj box at obj_off..+4, sub box at sub_off..+4;
                                              other columns get sigmoid(-30) ~ 0)
    Output slab per layer = cls + box  (column ranges disjoint).
    The hidden states are never written to HBM.
    """
    f32 = jnp.float32
    h = x_ref[...]                                      # (tm, 128) bf16
    for l in range(num_layers):                         # unrolled at trace time
        y = jnp.dot(h, dw_ref[l], preferred_element_type=f32) + db_ref[l]
        h = jnp.maximum(y, 0.0).astype(jnp.bfloat16)    # single f32->bf16 cast per layer

        cls = jnp.dot(h, clsw_ref[...], preferred_element_type=f32) + clsb_ref[...]

        t = jnp.maximum(jnp.dot(h, w1_ref[...], preferred_element_type=f32) + b1_ref[...], 0.0)
        t = t.astype(jnp.bfloat16)
        t = jnp.maximum(jnp.dot(t, w2_ref[...], preferred_element_type=f32) + b2_ref[...], 0.0)
        t = t.astype(jnp.bfloat16)
        box = jax.nn.sigmoid(jnp.dot(t, w3_ref[...], preferred_element_type=f32) + b3_ref[...])

        o_ref[l] = (cls + box).astype(o_ref.dtype)


# ----------------------------------------------------------------------------
# pallas_call wrappers
# ----------------------------------------------------------------------------
def pixel_memory(feat, pp, *, max_tm=512):
    """feat: (B, P, 3) f32 downsampled pixels -> (B, 128) f32 masked SUM of enc_src+pos."""
    B, P, _ = feat.shape
    Pp, tm = _row_plan(P, max_tm)
    x = jnp.pad(feat, ((0, 0), (0, Pp - P), (0, 0))).astype(jnp.float32)

    def const(shp):
        return pl.BlockSpec(shp, lambda b, j, _s=shp: tuple(0 for _ in _s))

    out = pl.pallas_call(
        functools.partial(_pixel_mem_kernel, pixels=P, tm=tm),
        out_shape=jax.ShapeDtypeStruct((B, 8, LANE), jnp.float32),
        grid_spec=pltpu.PrefetchScalarGridSpec(
            num_scalar_prefetch=0,
            grid=(B, Pp // tm),                              # batch parallel, rows reduce
            in_specs=[pl.BlockSpec((None, tm, 3), lambda b, j: (b, j, 0)),
                      const((8, LANE)), const((1, LANE)),
                      const((LANE, LANE)), const((1, LANE)),
                      const((LANE, LANE)), const((1, LANE))],
            out_specs=pl.BlockSpec((None, 8, LANE), lambda b, j: (b, 0, 0)),
            scratch_shapes=[pltpu.VMEM((8, LANE), jnp.float32)],
        ),
        compiler_params=pltpu.CompilerParams(
            dimension_semantics=("parallel", "arbitrary")),
    )(x, pp["bb_w"], pp["bb_b"], pp["pos_w"], pp["pos_b"], pp["inp_w"], pp["inp_b"])
    return out[:, 0, :]                                       # (B, 128) sum


def decoder_heads(x2d, pp, num_layers, *, max_tm=256):
    """x2d: (M, 128) queries(+memory) -> (L, M, 128) f32 fused-head output slab."""
    M = x2d.shape[0]
    Mp, tm = _row_plan(M, max_tm)
    xp = jnp.pad(x2d, ((0, Mp - M), (0, 0))).astype(jnp.bfloat16)
    L = num_layers

    def const(shp):
        return pl.BlockSpec(shp, lambda i, _s=shp: tuple(0 for _ in _s))

    out = pl.pallas_call(
        functools.partial(_decoder_heads_kernel, num_layers=L),
        out_shape=jax.ShapeDtypeStruct((L, Mp, LANE), jnp.float32),
        grid_spec=pltpu.PrefetchScalarGridSpec(
            num_scalar_prefetch=0,
            grid=(Mp // tm,),
            in_specs=[pl.BlockSpec((tm, LANE), lambda i: (i, 0)),
                      const((L, LANE, LANE)), const((L, 1, LANE)),      # decoder
                      const((LANE, LANE)), const((1, LANE)),            # cls (verb+obj)
                      const((LANE, 2 * LANE)), const((1, 2 * LANE)),    # packed MLP w1/b1
                      const((2 * LANE, 2 * LANE)), const((1, 2 * LANE)),  # w2/b2 (blockdiag)
                      const((2 * LANE, LANE)), const((1, LANE))],        # w3/b3
            out_specs=pl.BlockSpec((L, tm, LANE), lambda i: (0, i, 0)),
        ),
        compiler_params=pltpu.CompilerParams(dimension_semantics=("parallel",)),
    )(xp, pp["dec_w"], pp["dec_b"], pp["cls_w"], pp["cls_b"],
      pp["mlp_w1"], pp["mlp_b1"], pp["mlp_w2"], pp["mlp_b2"], pp["mlp_w3"], pp["mlp_b3"])
    return out[:, :M, :]


# ----------------------------------------------------------------------------
# Deterministic parameter construction (shapes follow DETRHOI.__init__)
# ----------------------------------------------------------------------------
def init_params(key, *, backbone_channels, hidden_dim, num_queries,
                num_obj_classes, num_classes, num_dec_layers):
    keys = iter(jax.random.split(key, 64))

    def lin(din, dout, scale=0.1):
        return (scale * jax.random.normal(next(keys), (din, dout), jnp.float32),
                scale * jax.random.normal(next(keys), (dout,), jnp.float32))

    p = {}
    # nn.Embedding(num_queries, hidden_dim)
    p["query_embed"] = jax.random.normal(next(keys), (num_queries, hidden_dim), jnp.float32)
    # input_proj: Conv2d(backbone.num_channels, hidden_dim, kernel_size=1)
    p["input_proj_w"], p["input_proj_b"] = lin(backbone_channels, hidden_dim)
    # verb / object classification heads
    p["hico_verb_w"], p["hico_verb_b"] = lin(hidden_dim, num_classes["hico"])
    p["vcoco_verb_w"], p["vcoco_verb_b"] = lin(hidden_dim, num_classes["vcoco"])
    p["obj_class_w"], p["obj_class_b"] = lin(hidden_dim, num_obj_classes + 1)
    # MLP(hidden, hidden, 4, 3) for obj / sub boxes
    for name in ("obj_bbox", "sub_bbox"):
        p[name + "_w1"], p[name + "_b1"] = lin(hidden_dim, hidden_dim)
        p[name + "_w2"], p[name + "_b2"] = lin(hidden_dim, hidden_dim)
        p[name + "_w3"], p[name + "_b3"] = lin(hidden_dim, 4)
    # surrogate backbone projection (3 -> backbone_channels)
    p["bb_proj_w"], p["bb_proj_b"] = lin(3, backbone_channels)
    # surrogate positional embedding projection
    p["pos_w"], p["pos_b"] = lin(backbone_channels, hidden_dim)
    # surrogate decoder layers (hidden -> hidden), one per "decoder layer"
    p["dec_w"], p["dec_b"] = [], []
    for _ in range(num_dec_layers):
        w, b = lin(hidden_dim, hidden_dim)
        p["dec_w"].append(w)
        p["dec_b"].append(b)
    return p


def pack_params(params, *, dataset, num_dec_layers):
    """Zero-pad / place all weights into lane slabs (bf16 weights, f32 biases)."""
    if dataset == "hico":
        vw, vb = params["hico_verb_w"], params["hico_verb_b"]
    elif dataset == "vcoco":
        vw, vb = params["vcoco_verb_w"], params["vcoco_verb_b"]
    else:
        raise ValueError(dataset)
    Cv = int(vw.shape[1])
    Co = int(params["obj_class_w"].shape[1])
    ob_off = Cv + Co
    sb_off = ob_off + 4
    # TODO(synk): real HICO counts overflow one 128-lane slab; need multi-slab heads.
    assert sb_off + 4 <= LANE, "fused head output does not fit in one 128-lane slab"

    L = num_dec_layers
    Q = params["query_embed"].shape[0]

    # --- packed 256-lane obj+sub bbox MLP (fills the v6e/v7x 256-wide MXU) ----
    w1 = jnp.concatenate([_pad_w(params["obj_bbox_w1"]),
                          _pad_w(params["sub_bbox_w1"])], axis=1)            # (128, 256)
    b1 = jnp.concatenate([_pad_b(params["obj_bbox_b1"]),
                          _pad_b(params["sub_bbox_b1"])], axis=1)            # (1, 256)
    w2 = jnp.zeros((2 * LANE, 2 * LANE), jnp.bfloat16)
    w2 = w2.at[:LANE, :LANE].set(_pad_w(params["obj_bbox_w2"]))
    w2 = w2.at[LANE:, LANE:].set(_pad_w(params["sub_bbox_w2"]))              # (256, 256)
    b2 = jnp.concatenate([_pad_b(params["obj_bbox_b2"]),
                          _pad_b(params["sub_bbox_b2"])], axis=1)            # (1, 256)
    w3 = jnp.concatenate([_pad_w(params["obj_bbox_w3"], c0=ob_off),
                          _pad_w(params["sub_bbox_w3"], c0=sb_off)], axis=0)  # (256, 128)
    # pack-time sigmoid masking: NEG_BIAS in all non-box columns -> sigmoid ~ 0 there
    # (padded box columns become ~1e-13, not exactly 0; consumers slice exact ranges).
    b3 = jnp.full((1, LANE), NEG_BIAS, jnp.float32)
    b3 = b3.at[0, ob_off:ob_off + 4].set(jnp.asarray(params["obj_bbox_b3"], jnp.float32))
    b3 = b3.at[0, sb_off:sb_off + 4].set(jnp.asarray(params["sub_bbox_b3"], jnp.float32))

    pp = {
        "num_verb": Cv, "num_obj": Co, "obj_off": ob_off, "sub_off": sb_off,
        # fused per-pixel projections + masked-sum memory
        "bb_w": _place2(params["bb_proj_w"], 8, LANE, 0, 0, jnp.float32),    # K=3 VPU path
        "bb_b": _pad_b(params["bb_proj_b"]),
        "pos_w": _pad_w(params["pos_w"]), "pos_b": _pad_b(params["pos_b"]),
        "inp_w": _pad_w(params["input_proj_w"]), "inp_b": _pad_b(params["input_proj_b"]),
        # queries (lane-padded)
        "query_embed_p": _place2(params["query_embed"], Q, LANE, 0, 0, jnp.float32),
        # fused decoder stack (L, 128, 128) / (L, 1, 128)
        "dec_w": jnp.stack([_pad_w(w) for w in params["dec_w"][:L]], 0),
        "dec_b": jnp.stack([_pad_b(b) for b in params["dec_b"][:L]], 0),
        # fused class heads: verb + obj class weights packed into one (128,128) slab
        "cls_w": _pad_w(vw) + _pad_w(params["obj_class_w"], c0=Cv),
        "cls_b": _pad_b(vb) + _pad_b(params["obj_class_b"], c0=Cv),
        # packed bbox MLPs
        "mlp_w1": w1, "mlp_b1": b1, "mlp_w2": w2, "mlp_b2": b2,
        "mlp_w3": w3, "mlp_b3": b3,
    }
    return pp


# ----------------------------------------------------------------------------
# DETRHOI forward, dtype == 'hoi'
# ----------------------------------------------------------------------------
def detrhoi_forward_hoi(samples_nhwc, params, *, dataset="hico", aux_loss=True,
                        num_dec_layers=3, stride=4):
    B, Himg, Wimg, _ = samples_nhwc.shape
    Hf, Wf = Himg // stride, Wimg // stride

    pp = pack_params(params, dataset=dataset, num_dec_layers=num_dec_layers)

    # --- surrogate backbone: avg-pool downsample (XLA glue) ------------------
    # TODO(synk): backbone (ResNet) + full DETR transformer are external modules.
    feat = samples_nhwc.reshape(B, Hf, stride, Wf, stride, 3).mean(axis=(2, 4))
    feat = feat.reshape(B, Hf * Wf, 3)

    # --- fused pixel projections + masked-mean memory (ONE pallas_call) ------
    # padding mask: all valid (False).  TODO(synk): NestedTensor per-image masks.
    mem_sum = pixel_memory(feat, pp)                     # (B, 128) f32 masked sum
    memory = mem_sum / jnp.float32(Hf * Wf)              # masked mean

    # --- fused surrogate decoder stack + all four heads (ONE pallas_call) ----
    Q = params["query_embed"].shape[0]
    q_plus_mem = pp["query_embed_p"][None, :, :] + memory[:, None, :]     # (B, Q, 128)
    L = num_dec_layers
    heads_out = decoder_heads(q_plus_mem.reshape(B * Q, LANE), pp, L)
    heads_out = heads_out.reshape(L, B, Q, LANE)

    Cv, Co = pp["num_verb"], pp["num_obj"]
    ob_off, sb_off = pp["obj_off"], pp["sub_off"]
    outputs_class = heads_out[..., :Cv]                  # (L,B,Q,Cv)
    outputs_obj_class = heads_out[..., Cv:Cv + Co]       # (L,B,Q,Co)
    outputs_obj_coord = heads_out[..., ob_off:ob_off + 4]
    outputs_sub_coord = heads_out[..., sb_off:sb_off + 4]

    out = {
        "pred_obj_logits": outputs_obj_class[-1],
        "pred_logits": outputs_class[-1],
        "pred_obj_boxes": outputs_obj_coord[-1],
        "pred_sub_boxes": outputs_sub_coord[-1],
        "type": "hoi",
        "dataset": dataset,
    }
    if aux_loss:
        out["aux_outputs"] = [
            {"pred_obj_logits": a, "pred_logits": b,
             "pred_sub_boxes": c, "pred_obj_boxes": d}
            for a, b, c, d in zip(outputs_obj_class[:-1], outputs_class[:-1],
                                  outputs_sub_coord[:-1], outputs_obj_coord[:-1])
        ]
    return out


# ----------------------------------------------------------------------------
if __name__ == "__main__":
    # Small deterministic config.
    B = 2
    IMG = 32                 # image H = W
    BACKBONE_CH = 8          # backbone.num_channels
    HIDDEN = 32              # transformer.d_model
    NUM_QUERIES = 8
    NUM_OBJ_CLASSES = 4      # -> obj logits = 5
    NUM_CLASSES = {"hico": 6, "vcoco": 5, "att": 7}
    NUM_DEC_LAYERS = 3

    key = jax.random.PRNGKey(0)
    k_img, k_par = jax.random.split(key)

    # NCHW PyTorch input would be (B, 3, IMG, IMG); we use NHWC (see layout).
    samples = jax.random.normal(k_img, (B, IMG, IMG, 3), jnp.float32)

    params = init_params(
        k_par,
        backbone_channels=BACKBONE_CH,
        hidden_dim=HIDDEN,
        num_queries=NUM_QUERIES,
        num_obj_classes=NUM_OBJ_CLASSES,
        num_classes=NUM_CLASSES,
        num_dec_layers=NUM_DEC_LAYERS,
    )

    out = detrhoi_forward_hoi(samples, params, dataset="hico", aux_loss=True,
                              num_dec_layers=NUM_DEC_LAYERS)

    jax.block_until_ready(out["pred_logits"])
    jax.block_until_ready(out["pred_obj_logits"])
    jax.block_until_ready(out["pred_obj_boxes"])
    jax.block_until_ready(out["pred_sub_boxes"])

    # Light sanity checks on shapes / value ranges.
    assert out["pred_logits"].shape == (B, NUM_QUERIES, NUM_CLASSES["hico"])
    assert out["pred_obj_logits"].shape == (B, NUM_QUERIES, NUM_OBJ_CLASSES + 1)
    assert out["pred_obj_boxes"].shape == (B, NUM_QUERIES, 4)
    assert out["pred_sub_boxes"].shape == (B, NUM_QUERIES, 4)
    assert len(out["aux_outputs"]) == NUM_DEC_LAYERS - 1
    assert bool(jnp.all((out["pred_obj_boxes"] >= 0) & (out["pred_obj_boxes"] <= 1)))
    assert bool(jnp.all((out["pred_sub_boxes"] >= 0) & (out["pred_sub_boxes"] <= 1)))

    print("KERNEL_OK")
</pallas_src>

<mosaic_0001>
module attributes {stable_mosaic.version = 11 : i64} {
  func.func @_pixel_mem_kernel(%arg0: i32, %arg1: i32, %arg2: memref<1x64x3xf32, #tpu.memory_space<vmem>>, %arg3: memref<8x128xf32, #tpu.memory_space<vmem>>, %arg4: memref<1x128xf32, #tpu.memory_space<vmem>>, %arg5: memref<128x128xbf16, #tpu.memory_space<vmem>>, %arg6: memref<1x128xf32, #tpu.memory_space<vmem>>, %arg7: memref<128x128xbf16, #tpu.memory_space<vmem>>, %arg8: memref<1x128xf32, #tpu.memory_space<vmem>>, %arg9: memref<1x8x128xf32, #tpu.memory_space<vmem>>, %arg10: memref<8x128xf32, #tpu.memory_space<vmem>>) attributes {dimension_semantics = [#tpu.dimension_semantics<parallel>, #tpu.dimension_semantics<arbitrary>], iteration_bounds = array<i64: 2, 1>, scalar_prefetch = 0 : i64, scratch_operands = 1 : i64, tpu.core_type = #tpu.core_type<tc>, window_params = [{transform_indices = @transform_0, window_bounds = array<i64: 1, 64, 3>}, {pipeline_mode = #tpu.pipeline_mode<synchronous>, transform_indices = @transform_1, window_bounds = array<i64: 8, 128>}, {pipeline_mode = #tpu.pipeline_mode<synchronous>, transform_indices = @transform_2, window_bounds = array<i64: 1, 128>}, {pipeline_mode = #tpu.pipeline_mode<synchronous>, transform_indices = @transform_3, window_bounds = array<i64: 128, 128>}, {pipeline_mode = #tpu.pipeline_mode<synchronous>, transform_indices = @transform_4, window_bounds = array<i64: 1, 128>}, {pipeline_mode = #tpu.pipeline_mode<synchronous>, transform_indices = @transform_5, window_bounds = array<i64: 128, 128>}, {pipeline_mode = #tpu.pipeline_mode<synchronous>, transform_indices = @transform_6, window_bounds = array<i64: 1, 128>}, {transform_indices = @transform_7, window_bounds = array<i64: 1, 8, 128>}]} {
    %c0_i32 = arith.constant 0 : i32
    %0 = arith.cmpi eq, %arg1, %c0_i32 : i32
    %1 = arith.extui %0 : i1 to i32
    %c0_i32_0 = arith.constant 0 : i32
    %2 = arith.cmpi ne, %1, %c0_i32_0 : i32
    scf.if %2 {
      %cst_27 = arith.constant 0.000000e+00 : f32
      %59 = vector.broadcast %cst_27 : f32 to vector<8x128xf32>
      %c0_28 = arith.constant 0 : index
      %c0_29 = arith.constant 0 : index
      %60 = vector.load %arg10[%c0_28, %c0_29] : memref<8x128xf32, #tpu.memory_space<vmem>>, vector<8x128xf32>
      tpu.vector_store %arg10[%c0_28, %c0_29], %59 {strides = array<i32>} : memref<8x128xf32, #tpu.memory_space<vmem>>, vector<8x128xf32>,
    } else {
    }
    %c0 = arith.constant 0 : index
    %c0_1 = arith.constant 0 : index
    %c0_2 = arith.constant 0 : index
    %3 = vector.load %arg2[%c0, %c0_1, %c0_2] : memref<1x64x3xf32, #tpu.memory_space<vmem>>, vector<1x64x3xf32>
    %4 = vector.shape_cast %3 : vector<1x64x3xf32> to vector<64x3xf32>
    %c0_3 = arith.constant 0 : index
    %c0_4 = arith.constant 0 : index
    %5 = vector.load %arg3[%c0_3, %c0_4] : memref<8x128xf32, #tpu.memory_space<vmem>>, vector<8x128xf32>
    %6 = vector.extract_strided_slice %4 {offsets = [0, 0], sizes = [64, 1], strides = [1, 1]} : vector<64x3xf32> to vector<64x1xf32>
    %7 = vector.extract_strided_slice %5 {offsets = [0, 0], sizes = [1, 128], strides = [1, 1]} : vector<8x128xf32> to vector<1x128xf32>
    %8 = vector.broadcast %6 : vector<64x1xf32> to vector<64x128xf32>
    %9 = vector.broadcast %7 : vector<1x128xf32> to vector<64x128xf32>
    %10 = arith.mulf %8, %9 : vector<64x128xf32>
    %11 = vector.extract_strided_slice %4 {offsets = [0, 1], sizes = [64, 1], strides = [1, 1]} : vector<64x3xf32> to vector<64x1xf32>
    %12 = vector.extract_strided_slice %5 {offsets = [1, 0], sizes = [1, 128], strides = [1, 1]} : vector<8x128xf32> to vector<1x128xf32>
    %13 = vector.broadcast %11 : vector<64x1xf32> to vector<64x128xf32>
    %14 = vector.broadcast %12 : vector<1x128xf32> to vector<64x128xf32>
    %15 = arith.mulf %13, %14 : vector<64x128xf32>
    %16 = arith.addf %10, %15 : vector<64x128xf32>
    %17 = vector.extract_strided_slice %4 {offsets = [0, 2], sizes = [64, 1], strides = [1, 1]} : vector<64x3xf32> to vector<64x1xf32>
    %18 = vector.extract_strided_slice %5 {offsets = [2, 0], sizes = [1, 128], strides = [1, 1]} : vector<8x128xf32> to vector<1x128xf32>
    %19 = vector.broadcast %17 : vector<64x1xf32> to vector<64x128xf32>
    %20 = vector.broadcast %18 : vector<1x128xf32> to vector<64x128xf32>
    %21 = arith.mulf %19, %20 : vector<64x128xf32>
    %22 = arith.addf %16, %21 : vector<64x128xf32>
    %c0_5 = arith.constant 0 : index
    %c0_6 = arith.constant 0 : index
    %23 = vector.load %arg4[%c0_5, %c0_6] : memref<1x128xf32, #tpu.memory_space<vmem>>, vector<1x128xf32>
    %24 = vector.broadcast %23 : vector<1x128xf32> to vector<64x128xf32>
    %25 = arith.addf %22, %24 : vector<64x128xf32>
    %26 = arith.truncf %25 : vector<64x128xf32> to vector<64x128xbf16>
    %c0_7 = arith.constant 0 : index
    %c0_8 = arith.constant 0 : index
    %27 = vector.load %arg5[%c0_7, %c0_8] : memref<128x128xbf16, #tpu.memory_space<vmem>>, vector<128x128xbf16>
    %cst = arith.constant dense<0.000000e+00> : vector<64x128xf32>
    %28 = tpu.matmul %26, %27, %cst {dimension_numbers = #tpu.dot_dimension_numbers<[1], [0], [0], [1], [0, 0, 1, 1], [], []>} : vector<64x128xbf16>, vector<128x128xbf16>, vector<64x128xf32> -> vector<64x128xf32>
    %c0_9 = arith.constant 0 : index
    %c0_10 = arith.constant 0 : index
    %29 = vector.load %arg6[%c0_9, %c0_10] : memref<1x128xf32, #tpu.memory_space<vmem>>, vector<1x128xf32>
    %30 = vector.broadcast %29 : vector<1x128xf32> to vector<64x128xf32>
    %31 = arith.addf %28, %30 : vector<64x128xf32>
    %c0_11 = arith.constant 0 : index
    %c0_12 = arith.constant 0 : index
    %32 = vector.load %arg7[%c0_11, %c0_12] : memref<128x128xbf16, #tpu.memory_space<vmem>>, vector<128x128xbf16>
    %cst_13 = arith.constant dense<0.000000e+00> : vector<64x128xf32>
    %33 = tpu.matmul %26, %32, %cst_13 {dimension_numbers = #tpu.dot_dimension_numbers<[1], [0], [0], [1], [0, 0, 1, 1], [], []>} : vector<64x128xbf16>, vector<128x128xbf16>, vector<64x128xf32> -> vector<64x128xf32>
    %c0_14 = arith.constant 0 : index
    %c0_15 = arith.constant 0 : index
    %34 = vector.load %arg8[%c0_14, %c0_15] : memref<1x128xf32, #tpu.memory_space<vmem>>, vector<1x128xf32>
    %35 = vector.broadcast %34 : vector<1x128xf32> to vector<64x128xf32>
    %36 = arith.addf %33, %35 : vector<64x128xf32>
    %37 = arith.addf %36, %31 : vector<64x128xf32>
    %c64_i32 = arith.constant 64 : i32
    %38 = arith.muli %arg1, %c64_i32 : i32
    %39 = tpu.iota {dimensions = array<i32: 0>} : vector<64x1xi32>
    %40 = vector.broadcast %38 : i32 to vector<64x1xi32>
    %41 = arith.addi %40, %39 : vector<64x1xi32>
    %c64_i32_16 = arith.constant 64 : i32
    %42 = vector.broadcast %c64_i32_16 : i32 to vector<64x1xi32>
    %43 = arith.cmpi slt, %41, %42 : vector<64x1xi32>
    %44 = arith.extui %43 : vector<64x1xi1> to vector<64x1xi32>
    %45 = arith.sitofp %44 : vector<64x1xi32> to vector<64x1xf32>
    %46 = vector.broadcast %45 : vector<64x1xf32> to vector<64x128xf32>
    %47 = arith.mulf %37, %46 : vector<64x128xf32>
    %cst_17 = arith.constant dense<0.000000e+00> : vector<128xf32>
    %48 = vector.multi_reduction <add>, %47, %cst_17 [0] : vector<64x128xf32> to vector<128xf32>
    %49 = vector.shape_cast %48 : vector<128xf32> to vector<1x128xf32>
    %c0_18 = arith.constant 0 : index
    %c0_19 = arith.constant 0 : index
    %50 = vector.load %arg10[%c0_18, %c0_19] : memref<8x128xf32, #tpu.memory_space<vmem>>, vector<8x128xf32>
    %51 = vector.shape_cast %49 : vector<1x128xf32> to vector<1x128xf32>
    %52 = vector.broadcast %51 : vector<1x128xf32> to vector<8x128xf32>
    %53 = arith.addf %50, %52 : vector<8x128xf32>
    %c0_20 = arith.constant 0 : index
    %c0_21 = arith.constant 0 : index
    %54 = vector.load %arg10[%c0_20, %c0_21] : memref<8x128xf32, #tpu.memory_space<vmem>>, vector<8x128xf32>
    tpu.vector_store %arg10[%c0_20, %c0_21], %53 {strides = array<i32>} : memref<8x128xf32, #tpu.memory_space<vmem>>, vector<8x128xf32>,
    %c0_22 = arith.constant 0 : index
    %c0_23 = arith.constant 0 : index
    %55 = vector.load %arg10[%c0_22, %c0_23] : memref<8x128xf32, #tpu.memory_space<vmem>>, vector<8x128xf32>
    %c0_24 = arith.constant 0 : index
    %c0_25 = arith.constant 0 : index
    %c0_26 = arith.constant 0 : index
    %56 = vector.load %arg9[%c0_24, %c0_25, %c0_26] : memref<1x8x128xf32, #tpu.memory_space<vmem>>, vector<1x8x128xf32>
    %57 = vector.shape_cast %56 : vector<1x8x128xf32> to vector<8x128xf32>
    %58 = vector.shape_cast %55 : vector<8x128xf32> to vector<1x8x128xf32>
    tpu.vector_store %arg9[%c0_24, %c0_25, %c0_26], %58 {strides = array<i32>} : memref<1x8x128xf32, #tpu.memory_space<vmem>>, vector<1x8x128xf32>,
    return
  }
  func.func @transform_0(%arg0: i32, %arg1: i32) -> (i32, i32, i32) {
    %c0_i32 = arith.constant 0 : i32
    %c0_i32_0 = arith.constant 0 : i32
    return %arg0, %arg1, %c0_i32 : i32, i32, i32
  }
  func.func @transform_1(%arg0: i32, %arg1: i32) -> (i32, i32) {
    %c0_i32 = arith.constant 0 : i32
    %c0_i32_0 = arith.constant 0 : i32
    %c0_i32_1 = arith.constant 0 : i32
    return %c0_i32, %c0_i32_0 : i32, i32
  }
  func.func @transform_2(%arg0: i32, %arg1: i32) -> (i32, i32) {
    %c0_i32 = arith.constant 0 : i32
    %c0_i32_0 = arith.constant 0 : i32
    %c0_i32_1 = arith.constant 0 : i32
    return %c0_i32, %c0_i32_0 : i32, i32
  }
  func.func @transform_3(%arg0: i32, %arg1: i32) -> (i32, i32) {
    %c0_i32 = arith.constant 0 : i32
    %c0_i32_0 = arith.constant 0 : i32
    %c0_i32_1 = arith.constant 0 : i32
    return %c0_i32, %c0_i32_0 : i32, i32
  }
  func.func @transform_4(%arg0: i32, %arg1: i32) -> (i32, i32) {
    %c0_i32 = arith.constant 0 : i32
    %c0_i32_0 = arith.constant 0 : i32
    %c0_i32_1 = arith.constant 0 : i32
    return %c0_i32, %c0_i32_0 : i32, i32
  }
  func.func @transform_5(%arg0: i32, %arg1: i32) -> (i32, i32) {
    %c0_i32 = arith.constant 0 : i32
    %c0_i32_0 = arith.constant 0 : i32
    %c0_i32_1 = arith.constant 0 : i32
    return %c0_i32, %c0_i32_0 : i32, i32
  }
  func.func @transform_6(%arg0: i32, %arg1: i32) -> (i32, i32) {
    %c0_i32 = arith.constant 0 : i32
    %c0_i32_0 = arith.constant 0 : i32
    %c0_i32_1 = arith.constant 0 : i32
    return %c0_i32, %c0_i32_0 : i32, i32
  }
  func.func @transform_7(%arg0: i32, %arg1: i32) -> (i32, i32, i32) {
    %c0_i32 = arith.constant 0 : i32
    %c0_i32_0 = arith.constant 0 : i32
    %c0_i32_1 = arith.constant 0 : i32
    return %arg0, %c0_i32, %c0_i32_0 : i32, i32, i32
  }
}

</mosaic_0001>

<bundles_post_ra>
// kernel: tpu_custom_call.1
= control target key start
LH: loop header
LB: loop body
LE: loop exit
PB: predicated region body
PF: predicated region fallthrough
CT: control target
= control target key end

     0   :  { %12 = vsyncpa [#allocation4], 0  ;;  %s1475_s0 = inlined_call_operand.vmem [shape: f32[2,64,3], index: 0, kind: input, shape index: {}]   ;;  %s1476_s1 = inlined_call_operand.vmem [shape: f32[8,128], index: 1, kind: input, shape index: {}]   ;;  %s1477_s2 = inlined_call_operand.vmem [shape: f32[1,128], index: 2, kind: input, shape index: {}]   ;;  %s1478_s3 = inlined_call_operand.vmem [shape: bf16[128,128], index: 3, kind: input, shape index: {}]   ;;  %s1479_s4 = inlined_call_operand.vmem [shape: f32[1,128], index: 4, kind: input, shape index: {}]   ;;  %s1480_s5 = inlined_call_operand.vmem [shape: bf16[128,128], index: 5, kind: input, shape index: {}]   ;;  %s1481_s6 = inlined_call_operand.vmem [shape: f32[1,128], index: 6, kind: input, shape index: {}]   ;;  %s1482_s7 = inlined_call_operand.hbm [shape: f32[2,8,128], index: 7, kind: output, shape index: {}]  }
   0x1   :  { %14 = vsyncpa [#allocation4 + $0x1], 0  ;;  %s1270_s24 = smov 0   ;;  %s1272_s25 = smov 0  }
   0x2   :  { %s1274_s26 = smov 0   ;;  %s1276_s27 = smov 0  }
   0x3   :  { %s1278_s28 = smov 0   ;;  %s1280_s29 = smov 0  }
   0x4 LB: > { %s931_s30 = sadd.s32 4294967295, %s1224_s29   ;;  %s932_s8 = sadd.s32 4294967294, %s1224_s29   ;;  %s1224_s29 = sphi %s1280_s29, %s20_s29   ;;  %s1220_s28 = sphi %s1278_s28, %s1489_s28   ;;  %s1216_s27 = sphi %s1276_s27, %s1488_s27   ;;  %s1212_s26 = sphi %s1274_s26, %s1487_s26   ;;  %s1208_s25 = sphi %s1272_s25, %s1486_s25   ;;  %s1204_s24 = sphi %s1270_s24, %s1485_s24  }
   0x5   : > { %s32_s9 = sadd.s32 1, %s1220_s28  ;;  %s193_s10 = sadd.s32 1, %s1212_s26 }
   0x6   : > { %p34_p0 = scmp.ge.s32.totalorder %s32_s9, 2  ;;  %p203_p1 = scmp.ne.s32.totalorder %s1212_s26, %s1208_s25 }
   0x7   : > { %p204_p2 = scmp.eq.s32.totalorder %s931_s30, 1  ;;  %p209_p3 = scmp.ne.s32.totalorder %s1208_s25, %s1204_s24 }
   0x8   : > { %s1491_s9 = smov (%p34_p0, %s32_s9), 0  ;;  %p210_p5 = scmp.eq.s32.totalorder %s932_s8, 1 }
   0x9   : > { %p1310_p4 = por %p204_p2, %p203_p1  ;;  %s190_s12 = ssub.s32 %s1220_s28, %s1491_s9 }
   0xa   : > { %p935_p6 = scmp.ge.s32.totalorder %s1224_s29, 1  ;;  %p191_p7 = scmp.eq.s32.totalorder %s190_s12, 0 }
   0xb   : > { %p1317_p8 = por %p210_p5, %p209_p3  ;;  %p259_p9 = scmp.lt.s32.totalorder %s1224_s29, 3 }
   0xc   : > { %s1323_s14 = scalar_select %p191_p7, %s1212_s26, %s193_s10  }
   0xd   : > { %p260_p10 = pnand %p935_p6, %p259_p9 }
   0xe   : > { %p296_p11 = scmp.lt.s32.totalorder (!%p260_p10), %s1216_s27, 1  ;;  %v1226_v0 = vmov (!%p260_p10), 2   ;;  %v1227_v1 = vmov (!%p260_p10), 1   ;;  %v1130_v4 = vld [vmem:[%s1478_s3] sm:$0xff] (!%p260_p10)   ;;  %v1228_v6 = vmov (!%p260_p10), 0   ;;  %v1132_v8 = vld [vmem:[%s1478_s3 + $0x8] sm:$0xff] (!%p260_p10)   ;;  %v360_v27 = vlaneseq (!%p260_p10) }
   0xf   : > { %263 = sbr.rel (%p260_p10) target bundleno = 476 (0x1dc), region = 48  ;;  %1121 = vset.pattern.permute.xlu0 (!%p260_p10), %v1226_v0  ;;  %1117 = vset.pattern.permute.xlu1 (!%p260_p10), %v1227_v1  ;;  %v1131_v5 = vld [vmem:[%s1480_s5] sm:$0xff] (!%p260_p10)   ;;  %v1133_v9 = vld [vmem:[%s1480_s5 + $0x8] sm:$0xff] (!%p260_p10)   ;;  %v1134_v10 = vld [vmem:[%s1478_s3 + $0x10] sm:$0xff] (!%p260_p10)   ;;  %s292_s23 = sand.u32 (!%p260_p10), 1, %s1208_s25  }
  0x10   : > { %987 = vmatprep.subr.bf16.mxu1 (!%p260_p10), %v1130_v4  ;;  %1011 = vmatprep.subr.bf16.mxu0 (!%p260_p10), %v1131_v5  ;;  %v1135_v11 = vld [vmem:[%s1480_s5 + $0x10] sm:$0xff] (!%p260_p10)   ;;  %v1136_v13 = vld [vmem:[%s1478_s3 + $0x18] sm:$0xff] (!%p260_p10)   ;;  %v1138_v16 = vld [vmem:[%s1478_s3 + $0x20] sm:$0xff] (!%p260_p10)   ;;  %v361_v30 = vshrl.u32 (!%p260_p10), %v360_v27, 7  ;;  %s936_s30 = sshll.u32 (!%p260_p10), %s292_s23, 3  ;;  %s959_s8 = sshll.u32 (!%p260_p10), %s1216_s27, 7 }
  0x11   : > { %988 = vmatpush3.bf16.msra.mxu1 (!%p260_p10), %v1130_v4  ;;  %1012 = vmatpush3.bf16.msra.mxu0 (!%p260_p10), %v1131_v5  ;;  %v1137_v14 = vld [vmem:[%s1480_s5 + $0x18] sm:$0xff] (!%p260_p10)   ;;  %v1139_v17 = vld [vmem:[%s1480_s5 + $0x20] sm:$0xff] (!%p260_p10)   ;;  %v1140_v18 = vld [vmem:[%s1478_s3 + $0x28] sm:$0xff] (!%p260_p10)   ;;  %s294_s10 = scalar_lea.vmem (!%p260_p10), [#allocation3], %s936_s30  ;;  %s845_s17 = scalar_lea.sflag (!%p260_p10), [#allocation4], %s292_s23 }
  0x12   : > { %989 = vmatprep.subr.bf16.mxu1 (!%p260_p10), %v1132_v8  ;;  %1013 = vmatprep.subr.bf16.mxu0 (!%p260_p10), %v1133_v9  ;;  %v1141_v19 = vld [vmem:[%s1480_s5 + $0x28] sm:$0xff] (!%p260_p10)   ;;  %v1142_v21 = vld [vmem:[%s1478_s3 + $0x30] sm:$0xff] (!%p260_p10)   ;;  %v1144_v24 = vld [vmem:[%s1478_s3 + $0x38] sm:$0xff] (!%p260_p10)   ;;  %v362_v33 = vsub.s32 (!%p260_p10), 0, %v361_v30  ;;  %v406_v34 = vsub.s32 (!%p260_p10), 1, %v361_v30  ;;  %v458_v35 = vsub.s32 (!%p260_p10), 2, %v361_v30 }
  0x13   : > { %v1143_v22 = vld [vmem:[%s1480_s5 + $0x30] sm:$0xff] (!%p260_p10)   ;;  %v1145_v25 = vld [vmem:[%s1480_s5 + $0x38] sm:$0xff] (!%p260_p10)   ;;  %v319_v36 = vld [vmem:[%s1476_s1] sm:$0xff] (!%p260_p10)  ;;  %s858_s12 = sshll.u32 (!%p260_p10), %s294_s10, 4  ;;  %s1430_s12 = int_to_ptr.vmem [resolvable:$true] %s858_s12 }
  0x14   : > { %v363_v39 = vrot.slane (!%p260_p10), %v319_v36, %v362_v33  ;;  %v407_v40 = vrot.slane (!%p260_p10), %v319_v36, %v406_v34  ;;  %v1404_v41 = vrot.slane (!%p260_p10), %v319_v36, %v458_v35  ;;  %v939_v56 = vld [vmem:[%s1477_s2] ss:$0 sm:$0xff] (!%p260_p10)  ;;  %s1146_s18 = scalar_lea.vmem (!%p260_p10), %s1430_s12, 128 }
  0x15   : > { %990 = vmatpush3.bf16.msra.mxu1 (!%p260_p10), %v1132_v8  ;;  %1014 = vmatpush3.bf16.msra.mxu0 (!%p260_p10), %v1133_v9  ;;  %p1147_p12 = scmp.ne.s32.totalorder (!%p260_p10), %s1430_s12, %s1146_s18 }
  0x16   : > { %s297_s15 = scalar_select %p296_p11, %s1216_s27, 1  ;;  %991 = vmatprep.subr.bf16.mxu1 %v1134_v10  ;;  %1015 = vmatprep.subr.bf16.mxu0 %v1135_v11 }
  0x17   : > { %p1148_p13 = pnand %p1147_p12, %p1310_p4  ;;  %s1229_s27 = smov [#allocation3]  }
  0x18   : > { %s962_s16 = sshll.u32 %s297_s15, 6  ;;  %s1150_s20 = sshll.u32 %s1229_s27, 4  ;;  %s1151_s20 = int_to_ptr.vmem [resolvable:$false] %s1150_s20 }
  0x19   : > { %s1332_s19 = scalar_lea.vmem %s1475_s0, %s962_s16  ;;  %992 = vmatpush3.bf16.msra.mxu1 %v1134_v10  ;;  %1016 = vmatpush3.bf16.msra.mxu0 %v1135_v11  ;;  %s1428_s16 = scalar_lea.hbm %s1482_s7, %s959_s8 }
  0x1a   : > { %v312_v2 = vld [vmem:[%s1332_s19 + $0x8] sm:$0xff]  ;;  %v311_v3 = vld [vmem:[%s1332_s19] sm:$0xff]  ;;  %v314_v7 = vld [vmem:[%s1332_s19 + $0x18] sm:$0xff]  ;;  %993 = vmatprep.subr.bf16.mxu1 %v1136_v13  ;;  %1017 = vmatprep.subr.bf16.mxu0 %v1137_v14  ;;  %p1149_p0 = pneg %p1148_p13  ;;  %s1152_s21 = scalar_lea.vmem %s1151_s20, 256 }
  0x1b   : > { %429 = vperm.xlu0 %1121, %v312_v2   ;;  %373 = vperm.xlu1 %1117, %v311_v3   ;;  %v313_v12 = vld [vmem:[%s1332_s19 + $0x10] sm:$0xff]  ;;  %v315_v15 = vld [vmem:[%s1332_s19 + $0x20] sm:$0xff]  ;;  %v316_v20 = vld [vmem:[%s1332_s19 + $0x28] sm:$0xff]  ;;  %p1153_p1 = scmp.lt.s32.totalorder %s1430_s12, %s1151_s20  ;;  %p1154_p2 = scmp.lt.s32.totalorder %s1152_s21, %s1146_s18 }
  0x1c   : > { %v317_v23 = vld [vmem:[%s1332_s19 + $0x30] sm:$0xff]  ;;  %v318_v26 = vld [vmem:[%s1332_s19 + $0x38] sm:$0xff] }
  0x1d   : > { %994 = vmatpush3.bf16.msra.mxu1 %v1136_v13  ;;  %1018 = vmatpush3.bf16.msra.mxu0 %v1137_v14  ;;  %p1155_p3 = por %p1154_p2, %p1153_p1 }
  0x1e   : > { %995 = vmatprep.subr.bf16.mxu1 %v1138_v16  ;;  %1019 = vmatprep.subr.bf16.mxu0 %v1139_v17 }
  0x1f   : > { %1122 = vset.pattern.permute.xlu0 %v1228_v6  ;;  %377 = vperm.xlu1 %1117, %v312_v2   ;;  %p1156_p5 = pnand %p1155_p3, %p1149_p0 }
  0x20   : > { %322 = vperm.xlu0 %1122, %v311_v3  }
  0x21   : > { %996 = vmatpush3.bf16.msra.mxu1 %v1138_v16  ;;  %1020 = vmatpush3.bf16.msra.mxu0 %v1139_v17 }
  0x22   : > { %997 = vmatprep.subr.bf16.mxu1 %v1140_v18  ;;  %1021 = vmatprep.subr.bf16.mxu0 %v1141_v19 }
  0x23   : > { %1118 = vset.pattern.permute.xlu1 %v1228_v6 }
  0x24   : > { %327 = vperm.xlu0 %1122, %v312_v2   ;;  %337 = vperm.xlu1 %1118, %v314_v7  }
  0x25   : > { %998 = vmatpush3.bf16.msra.mxu1 %v1140_v18  ;;  %1022 = vmatpush3.bf16.msra.mxu0 %v1141_v19 }
  0x26   : > { %999 = vmatprep.subr.bf16.mxu1 %v1142_v21  ;;  %1023 = vmatprep.subr.bf16.mxu0 %v1143_v22 }
  0x28   : > { %332 = vperm.xlu0 %1122, %v313_v12   ;;  %1119 = vset.pattern.permute.xlu1 %v1227_v1 }
  0x29   : > { %385 = vperm.xlu1 %1119, %v314_v7   ;;  %1000 = vmatpush3.bf16.msra.mxu1 %v1142_v21 }
  0x2a   : > { %1024 = vmatpush3.bf16.msra.mxu0 %v1143_v22  ;;  %1001 = vmatprep.subr.bf16.mxu1 %v1144_v24 }
  0x2b   : > { %1025 = vmatprep.subr.bf16.mxu0 %v1145_v25 }
  0x2c   : > { %342 = vperm.xlu0 %1122, %v315_v15  }
  0x2d   : > { %1120 = vset.pattern.permute.xlu1 %v1226_v0  ;;  %1002 = vmatpush3.bf16.msra.mxu1 %v1144_v24 }
  0x2e   : > { %425 = vperm.xlu1 %1120, %v311_v3   ;;  %1026 = vmatpush3.bf16.msra.mxu0 %v1145_v25 }
  0x30   : > { %1123 = vset.pattern.permute.xlu0 %v1227_v1 }
  0x31   : > { %381 = vperm.xlu0 %1123, %v313_v12  }
  0x32   : > { %433 = vperm.xlu1 %1120, %v313_v12  }
  0x35   : > { %393 = vperm.xlu0 %1123, %v316_v20  }
  0x36   : > { %437 = vperm.xlu1 %1120, %v314_v7  }
  0x39   : > { %397 = vperm.xlu0 %1123, %v317_v23  }
  0x3a   : > { %1124 = vset.pattern.permute.xlu1 %v1228_v6 }
  0x3b   : > { %347 = vperm.xlu1 %1124, %v316_v20  }
  0x3d   : > { %1128 = vset.pattern.permute.xlu0 %v1226_v0 }
  0x3e   : > { %441 = vperm.xlu0 %1128, %v315_v15  }
  0x3f   : > { %1125 = vset.pattern.permute.xlu1 %v1227_v1 }
  0x40   : > { %389 = vperm.xlu1 %1125, %v315_v15  }
  0x42   : > { %453 = vperm.xlu0 %1128, %v318_v26  }
  0x44   : > { %1126 = vset.pattern.permute.xlu1 %v1228_v6 }
  0x45   : > { %352 = vperm.xlu1 %1126, %v317_v23  }
  0x49   : > { %357 = vperm.xlu1 %1126, %v318_v26  }
  0x4d   : > { %1127 = vset.pattern.permute.xlu1 %v1227_v1 }
  0x4e   : > { %401 = vperm.xlu1 %1127, %v318_v26  }
  0x52   : > { %1129 = vset.pattern.permute.xlu1 %v1226_v0 }
  0x53   : > { %445 = vperm.xlu1 %1129, %v316_v20  }
  0x57   : > { %449 = vperm.xlu1 %1129, %v317_v23  }
  0x9a   : > { %v374_v28 = vpop.permute.xlu1 %373  ;;  %v430_v29 = vpop.permute.xlu0 %429 }
  0x9b   : > { %v461_v46 = vmul.f32 %v1404_v41, %v430_v29  ;;  %v408_v50 = vmul.f32 %v407_v40, %v374_v28 }
  0x9e   : > { %v378_v31 = vpop.permute.xlu1 %377 }
  0x9f   : > { %v323_v32 = vpop.permute.xlu0 %322  ;;  %v409_v44 = vmul.f32 %v407_v40, %v378_v31 }
  0xa0   : > { %v364_v47 = vmul.f32 %v363_v39, %v323_v32 }
  0xa2   : > { %v416_v52 = vadd.f32 %v408_v50, %v364_v47  ;;  %v940_v50 = vld [vmem:[%s1479_s4] ss:$0 sm:$0xff] }
  0xa3   : > { %v328_v37 = vpop.permute.xlu0 %327  ;;  %v338_v38 = vpop.permute.xlu1 %337 }
  0xa4   : > { %v365_v42 = vmul.f32 %v363_v39, %v328_v37  ;;  %v367_v2 = vmul.f32 %v363_v39, %v338_v38 }
  0xa6   : > { %v417_v48 = vadd.f32 %v409_v44, %v365_v42 }
  0xa7   : > { %v333_v43 = vpop.permute.xlu0 %332 }
  0xa8   : > { %v386_v45 = vpop.permute.xlu1 %385  ;;  %v469_v53 = vadd.f32 %v461_v46, %v417_v48  ;;  %v366_v55 = vmul.f32 %v363_v39, %v333_v43 }
  0xa9   : > { %v411_v61 = vmul.f32 %v407_v40, %v386_v45 }
  0xaa   : > { %v484_v0 = vadd.f32 %v939_v56, %v469_v53 }
  0xab   : > { %v343_v49 = vpop.permute.xlu0 %342  ;;  %v419_v5 = vadd.f32 %v411_v61, %v367_v2 }
  0xac   : > { %v368_v20 = vmul.f32 %v363_v39, %v343_v49 }
  0xad   : > { %v426_v51 = vpop.permute.xlu1 %425 }
  0xae   : > { %v460_v54 = vmul.f32 %v1404_v41, %v426_v51 }
  0xb0   : > { %v468_v57 = vadd.f32 %v460_v54, %v416_v52  ;;  %v382_v58 = vpop.permute.xlu0 %381 }
  0xb1   : > { %v410_v59 = vmul.f32 %v407_v40, %v382_v58  ;;  %v434_v60 = vpop.permute.xlu1 %433 }
  0xb2   : > { %v462_v62 = vmul.f32 %v1404_v41, %v434_v60  ;;  %v483_v63 = vadd.f32 %v939_v56, %v468_v57 }
  0xb3   : > { %v418_v1 = vadd.f32 %v410_v59, %v366_v55 }
  0xb4   : > { %v491_v3 = vpack.c.bf16 %v484_v0, %v483_v63  ;;  %v394_v13 = vpop.permute.xlu0 %393 }
  0xb5   : > { %v438_v4 = vpop.permute.xlu1 %437  ;;  %v470_v6 = vadd.f32 %v462_v62, %v418_v1  ;;  %v413_v22 = vmul.f32 %v407_v40, %v394_v13 }
  0xb6   : > { %v463_v7 = vmul.f32 %v1404_v41, %v438_v4  ;;  %1003 = vmatprep.mubr.bf16.mxu1 %v491_v3  ;;  %1027 = vmatprep.mubr.bf16.mxu0 %v491_v3 }
  0xb7   : > { %v485_v9 = vadd.f32 %v939_v56, %v470_v6 }
  0xb8   : > { %v471_v8 = vadd.f32 %v463_v7, %v419_v5  ;;  %v398_v16 = vpop.permute.xlu0 %397 }
  0xb9   : > { %v414_v30 = vmul.f32 %v407_v40, %v398_v16 }
  0xba   : > { %v486_v10 = vadd.f32 %v939_v56, %v471_v8  ;;  %v348_v11 = vpop.permute.xlu1 %347 }
  0xbb   : > { %v369_v23 = vmul.f32 %v363_v39, %v348_v11 }
  0xbc   : > { %v492_v12 = vpack.c.bf16 %v486_v10, %v485_v9 }
  0xbd   : > { %v442_v19 = vpop.permute.xlu0 %441  ;;  %v421_v29 = vadd.f32 %v413_v22, %v369_v23 }
  0xbe   : > { %1004 = vmatmul.mubr.bf16.vlgmr.msra.gmra.mrb[0].mxu1 %v492_v12  ;;  %1028 = vmatmul.mubr.bf16.vlgmr.msra.gmra.mrb[0].mxu0 %v492_v12  ;;  %v464_v25 = vmul.f32 %v1404_v41, %v442_v19 }
  0xbf   : > { %v390_v14 = vpop.permute.xlu1 %389 }
  0xc0   : > { %v412_v18 = vmul.f32 %v407_v40, %v390_v14 }
  0xc1   : > { %v454_v27 = vpop.permute.xlu0 %453 }
  0xc2   : > { %v420_v24 = vadd.f32 %v412_v18, %v368_v20  ;;  %v467_v35 = vmul.f32 %v1404_v41, %v454_v27 }
  0xc4   : > { %v353_v15 = vpop.permute.xlu1 %352  ;;  %v472_v31 = vadd.f32 %v464_v25, %v420_v24 }
  0xc5   : > { %v370_v33 = vmul.f32 %v363_v39, %v353_v15 }
  0xc6   : > { %v487_v38 = vadd.f32 %v939_v56, %v472_v31 }
  0xc7   : > { %v422_v43 = vadd.f32 %v414_v30, %v370_v33 }
  0xc8   : > { %v358_v17 = vpop.permute.xlu1 %357 }
  0xc9   : > { %v371_v28 = vmul.f32 %v363_v39, %v358_v17 }
  0xcd   : > { %v402_v21 = vpop.permute.xlu1 %401 }
  0xce   : > { %v415_v26 = vmul.f32 %v407_v40, %v402_v21 }
  0xd0   : > { %v423_v34 = vadd.f32 %v415_v26, %v371_v28 }
  0xd2   : > { %v446_v32 = vpop.permute.xlu1 %445  ;;  %v475_v44 = vadd.f32 %v467_v35, %v423_v34 }
  0xd3   : > { %v465_v36 = vmul.f32 %v1404_v41, %v446_v32 }
  0xd4   : > { %v490_v49 = vadd.f32 %v939_v56, %v475_v44 }
  0xd5   : > { %v473_v37 = vadd.f32 %v465_v36, %v421_v29 }
  0xd6   : > { %v450_v42 = vpop.permute.xlu1 %449 }
  0xd7   : > { %v488_v45 = vadd.f32 %v939_v56, %v473_v37  ;;  %v466_v46 = vmul.f32 %v1404_v41, %v450_v42  ;;  %v949_v41 = vld [vmem:[%s1481_s6] ss:$0 sm:$0xff] }
  0xd9   : > { %v474_v47 = vadd.f32 %v466_v46, %v422_v43  ;;  %v493_v48 = vpack.c.bf16 %v488_v45, %v487_v38 }
  0xdb   : > { %v489_v40 = vadd.f32 %v939_v56, %v474_v47  ;;  %1007 = vmatprep.mubr.bf16.mxu1 %v493_v48  ;;  %1031 = vmatprep.mubr.bf16.mxu0 %v493_v48 }
  0xdd   : > { %v494_v39 = vpack.c.bf16 %v490_v49, %v489_v40 }
  0xdf   : > { %1008 = vmatmul.mubr.bf16.gmra.mrb[4].mxu1 %v494_v39  ;;  %1032 = vmatmul.mubr.bf16.gmra.mrb[4].mxu0 %v494_v39 }
 0x191   : > { %v1005_v51 = vpop.f32.mrb[0].mxu1  ;;  %v1029_v52 = vpop.f32.mrb[0].mxu0 }
 0x192   : > { %v609_v53 = vadd.f32 %v1005_v51, %v940_v50  ;;  %v600_v54 = vpop.f32.mrb[1].mxu1  ;;  %v736_v55 = vpop.f32.mrb[1].mxu0 }
 0x193   : > { %v601_v57 = vadd.f32 %v940_v50, %v600_v54  ;;  %v1006_v56 = vpop.f32.mrb[2].mxu1  ;;  %v1030_v58 = vpop.f32.mrb[2].mxu0 }
 0x194   : > { %v1036_v59 = vadd.f32 %v1029_v52, %v609_v53  ;;  %v612_v60 = vadd.f32 %v1006_v56, %v940_v50  ;;  %v603_v61 = vpop.f32.mrb[3].mxu1  ;;  %v739_v62 = vpop.f32.mrb[3].mxu0 }
 0x195   : > { %v1039_v63 = vadd.f32 %v736_v55, %v601_v57  ;;  %v604_v0 = vadd.f32 %v940_v50, %v603_v61 }
 0x196   : > { %v1042_v1 = vadd.f32 %v949_v41, %v612_v60  ;;  %v1037_v6 = vadd.f32 %v1036_v59, %v949_v41 }
 0x197   : > { %v1045_v2 = vadd.f32 %v949_v41, %v604_v0  ;;  %v1040_v4 = vadd.f32 %v1039_v63, %v949_v41 }
 0x198   : > { %v1043_v3 = vadd.f32 %v1042_v1, %v1030_v58 }
 0x199   : > { %v1046_v5 = vadd.f32 %v1045_v2, %v739_v62 }
 0x19b   : > { %v826_v7 = vadd.f32 %v1046_v5, %v1040_v4 }
 0x19d   : > { %v827_v8 = vadd.f32 %v1037_v6, %v826_v7 }
 0x19f   : > { %v828_v9 = vadd.f32 %v1043_v3, %v827_v8 }
 0x1b2   : > { %v1009_v10 = vpop.f32.mrb[4].mxu1  ;;  %v1033_v11 = vpop.f32.mrb[4].mxu0 }
 0x1b3   : > { %v625_v12 = vadd.f32 %v1009_v10, %v940_v50  ;;  %v616_v13 = vpop.f32.mrb[5].mxu1  ;;  %v752_v14 = vpop.f32.mrb[5].mxu0 }
 0x1b4   : > { %v617_v15 = vadd.f32 %v940_v50, %v616_v13  ;;  %v1010_v16 = vpop.f32.mrb[6].mxu1  ;;  %v1034_v17 = vpop.f32.mrb[6].mxu0 }
 0x1b5   : > { %v1048_v18 = vadd.f32 %v949_v41, %v625_v12  ;;  %v628_v19 = vadd.f32 %v1010_v16, %v940_v50  ;;  %v619_v20 = vpop.f32.mrb[7].mxu1  ;;  %v755_v21 = vpop.f32.mrb[7].mxu0 }
 0x1b6   : > { %v1051_v22 = vadd.f32 %v949_v41, %v617_v15  ;;  %v620_v23 = vadd.f32 %v940_v50, %v619_v20 }
 0x1b7   : > { %v1049_v24 = vadd.f32 %v1048_v18, %v1033_v11  ;;  %v1054_v25 = vadd.f32 %v949_v41, %v628_v19 }
 0x1b8   : > { %v1052_v26 = vadd.f32 %v1051_v22, %v752_v14  ;;  %v1057_v27 = vadd.f32 %v949_v41, %v620_v23 }
 0x1b9   : > { %v1055_v28 = vadd.f32 %v1054_v25, %v1034_v17 }
 0x1ba   : > { %v829_v29 = vadd.f32 %v1052_v26, %v828_v9  ;;  %v1058_v30 = vadd.f32 %v1057_v27, %v755_v21 }
 0x1bc   : > { %v830_v31 = vadd.f32 %v1058_v30, %v829_v29 }
 0x1be   : > { %v831_v32 = vadd.f32 %v1049_v24, %v830_v31 }
 0x1c0   : > { %v832_v33 = vadd.f32 %v1055_v28, %v831_v32 }
 0x1c2   : > { %v833_v34 = vrot.slane %v832_v33, 4 }
 0x1c4   : > { %v834_v35 = vadd.f32 %v833_v34, %v832_v33 }
 0x1c6   : > { %v835_v36 = vrot.slane %v834_v35, 2 }
 0x1c8   : > { %v836_v37 = vadd.f32 %v835_v36, %v834_v35 }
 0x1ca   : > { %v837_v38 = vrot.slane %v836_v37, 1 }
 0x1cc   : > { %v838_v42 = vadd.f32 %v837_v38, %v836_v37 }
 0x1ce   : > { %843 = vst [vmem:[%s294_s10] sm:$0xff] %v838_v42 }
 0x1cf   : > { %1159 = shalt.err (!%p1156_p5)
}
 0x1d0   : > { %s1160_s22 = scalar_lea.hbm %s1428_s16, 128  ;;  %s1164_s8 = scalar_lea.hbm %s1482_s7, 256 }
 0x1d1   : > { %p1161_p6 = scmp.ne.s32.totalorder %s1428_s16, %s1160_s22  ;;  %p1165_p10 = scmp.lt.u32.totalorder %s1428_s16, %s1482_s7 }
 0x1d2   : > { %p1166_p11 = scmp.lt.u32.totalorder %s1164_s8, %s1160_s22  ;;  %p1168_p13 = scmp.lt.u32.totalorder %s1160_s22, %s1428_s16 }
 0x1d3   : > { %p1162_p7 = pnand %p1161_p6, %p1310_p4 }
 0x1d4   : > { %p1167_p12 = por %p1166_p11, %p1165_p10 }
 0x1d5   : > { %p1163_p9 = pneg %p1162_p7 }
 0x1d6   : > { %p1169_p0 = por %p1168_p13, %p1167_p12 }
 0x1d8   : > { %p1170_p1 = pnand %p1169_p0, %p1163_p9 }
 0x1da   : > { %1173 = shalt.err (!%p1170_p1)
}
 0x1db   : > { %1059 = dma.vmem_to_hbm [thread:$0]  (%p1310_p4), %s1430_s12, 128, %s1428_s16, %s845_s17  }
 0x1dc PF: > { %p1065_p2 = scmp.ge.s32.totalorder %s1224_s29, 2  ;;  %s870_s15 = sand.u32 1, %s1204_s24  }
 0x1dd   : > { %s871_s18 = scalar_lea.sflag [#allocation4], %s870_s15 }
 0x1de   : > { %p1062_p3 = pnand %p1065_p2, %p1317_p8 }
 0x1e0   : > { %1199 = dma.done.wait (!%p1062_p3), %s871_s18, 128  }
 0x1e1   : > { %1201 = vsyncadd (!%p1062_p3), %s871_s18, 4294967168  ;;  %s20_s29 = sadd.s32 1, %s1224_s29   ;;  %s1485_s24 = smov %s1208_s25 }
 0x1e2   : > { %p17_p5 = scmp.ge.s32.totalorder %s20_s29, 4   ;;  %s1486_s25 = smov %s1212_s26 }
 0x1e3   : > { %s1487_s26 = smov %s1323_s14  ;;  %s1488_s27 = smov %s1220_s28 }
 0x1e4   : > { %s1489_s28 = smov %s1491_s9  ;;  %19 = sbr.rel (!%p17_p5) target bundleno = 4 (0x4), region = 87 }
 0x1eb   :  { %876 = vsyncpa [#allocation4], 1 }
 0x1ec   :  { %878 = vsyncpa [#allocation4 + $0x1], 1 }

</bundles_post_ra>
